<compile_context>
chip_gen: v7x
topology: tpu7x:2x2x1
jax: 0.10.0
libtpu: 0.0.40
codegen_flags: <defaults>
</compile_context>

<pallas_src>
import jax
import jax.numpy as jnp
from jax.experimental import pallas as pl
from jax.experimental.pallas import tpu as pltpu


def _round_up(v, m):
    return pl.cdiv(v, m) * m


# ----------------------------------------------------------------------------
# Small-F/U path (module defaults): VPU direct difference, batch on lanes.
# ----------------------------------------------------------------------------
def _rbf_vpu_kernel(xT_ref, c_ref, nir2_ref, o_ref):
    # xT_ref:   (F, TN)      batch on the lane axis
    # c_ref:    (U_pad, F)   centers (resident, tiny)
    # nir2_ref: (U_pad, 1)   precomputed -1 / r^2
    # o_ref:    (U_pad, TN)  lane-dense output tile
    x = xT_ref[...]
    c = c_ref[...]
    n_feat = x.shape[0]
    d0 = c[:, 0:1] - x[0:1, :]                    # (U_pad, TN)
    acc = d0 * d0
    for f in range(1, n_feat):                    # static unroll, F is small here
        d = c[:, f:f + 1] - x[f:f + 1, :]
        acc = acc + d * d
    o_ref[...] = jnp.exp(acc * nir2_ref[...])     # single mul + exp epilogue


def _rbf_small(x, c, r, *, tile_n=2048):
    N, F = x.shape
    U = c.shape[0]

    u_pad = _round_up(U, 8)                       # sublane-aligned output rows

    # Lane tile over the batch: multiple of 128, capped at the padded batch.
    tile_n = max(128, (tile_n // 128) * 128)
    n_min = _round_up(N, 128)
    tile_n = min(tile_n, n_min)
    # v7x: if the batch allows, split into >=2 grid steps so the ("parallel",)
    # axis can shard across both TensorCores instead of idling one.
    if n_min >= 256 and n_min // tile_n < 2:
        tile_n = max(128, _round_up(n_min // 2, 128))
    n_pad = _round_up(N, tile_n)                  # no silently-dropped rows

    xT = jnp.zeros((F, n_pad), x.dtype).at[:, :N].set(x.T)
    c_pad = jnp.zeros((u_pad, F), c.dtype).at[:U, :].set(c)
    nir2 = jnp.zeros((u_pad, 1), jnp.float32)     # pad rows -> exp(0)=1, bounded
    nir2 = nir2.at[:U, 0].set(-1.0 / jnp.square(r).astype(jnp.float32))

    grid = (n_pad // tile_n,)
    out_t = pl.pallas_call(
        _rbf_vpu_kernel,
        out_shape=jax.ShapeDtypeStruct((u_pad, n_pad), jnp.float32),
        grid_spec=pltpu.PrefetchScalarGridSpec(
            num_scalar_prefetch=0,
            grid=grid,
            in_specs=[
                pl.BlockSpec((F, tile_n), lambda i: (0, i)),    # x tile (lanes=N)
                pl.BlockSpec((u_pad, F), lambda i: (0, 0)),     # centers (full)
                pl.BlockSpec((u_pad, 1), lambda i: (0, 0)),     # -1/r^2 (full)
            ],
            out_specs=pl.BlockSpec((u_pad, tile_n), lambda i: (0, i)),
        ),
        compiler_params=pltpu.CompilerParams(
            dimension_semantics=("parallel",),
        ),
    )(xT, c_pad, nir2)

    # Module contract is (N, U); the transpose is layout plumbing outside the
    # kernel.  Consumers that can use the lane-dense (U, N) slab should take
    # out_t[:U, :N] directly and skip this HBM round-trip.
    return out_t[:U, :N].T


# ----------------------------------------------------------------------------
# Large-F/U path: MXU expansion with F-axis accumulation.
# Inner loop is a pure matmul-accumulate; norms / scale / exp in the epilogue.
# ----------------------------------------------------------------------------
def _rbf_mxu_kernel(x_ref, ct_ref, x2_ref, c2_ref, nir2_ref, o_ref, acc_ref):
    # x_ref: (tm, tk), ct_ref: (tk, tn) [pre-transposed centers],
    # x2_ref: (tm, 1), c2_ref: (1, tn), nir2_ref: (1, tn), o_ref/acc: (tm, tn)
    k = pl.program_id(2)

    @pl.when(k == 0)
    def _():
        acc_ref[...] = jnp.zeros_like(acc_ref)

    # Pure MXU work in the hot loop: acc += x . c^T  (centers already (F, U)).
    acc_ref[...] += jnp.dot(x_ref[...], ct_ref[...],
                            preferred_element_type=jnp.float32)

    @pl.when(k == pl.num_programs(2) - 1)
    def _():
        # d2 = |x|^2 + |c|^2 - 2 x.c, clamped at 0 to kill cancellation.
        d2 = jnp.maximum(x2_ref[...] + c2_ref[...] - 2.0 * acc_ref[...], 0.0)
        o_ref[...] = jnp.exp(d2 * nir2_ref[...])


def _rbf_large(x, c, r, *, tm=512, tn=512, tk=512, use_bf16=False):
    N, F = x.shape
    U = c.shape[0]

    # Adapt tiles to the problem so mid-sized shapes are not over-padded.
    tm = max(128, min(tm, _round_up(N, 128)))
    tn = max(128, min(tn, _round_up(U, 128)))
    tk = max(128, min(tk, _round_up(F, 128)))
    n_pad = _round_up(N, tm)
    u_pad = _round_up(U, tn)
    f_pad = _round_up(F, tk)

    # v7x has 2 TensorCores: make sure the parallel grid has >=2 tiles when the
    # problem allows, splitting the larger axis into 128-aligned chunks.
    if (n_pad // tm) * (u_pad // tn) < 2:
        if n_pad >= u_pad and n_pad >= 256:
            tm = n_pad // 2 if (n_pad // 2) % 128 == 0 else 128
            n_pad = _round_up(N, tm)
        elif u_pad >= 256:
            tn = u_pad // 2 if (u_pad // 2) % 128 == 0 else 128
            u_pad = _round_up(U, tn)

    mm_dtype = jnp.bfloat16 if use_bf16 else x.dtype
    x_pad = jnp.zeros((n_pad, f_pad), jnp.float32).at[:N, :F].set(
        x.astype(jnp.float32))
    cT_pad = jnp.zeros((f_pad, u_pad), jnp.float32).at[:F, :U].set(
        c.astype(jnp.float32).T)                  # pre-transposed: no in-kernel vxpose

    # Hoisted row norms (computed once, f32) and -1/r^2.
    x2 = jnp.sum(x_pad * x_pad, axis=1, keepdims=True)          # (n_pad, 1)
    c2 = jnp.sum(cT_pad * cT_pad, axis=0, keepdims=True)        # (1, u_pad)
    nir2 = jnp.zeros((1, u_pad), jnp.float32)    # pad cols -> exp(0)=1, bounded
    nir2 = nir2.at[0, :U].set(-1.0 / jnp.square(r).astype(jnp.float32))

    x_mm = x_pad.astype(mm_dtype)
    cT_mm = cT_pad.astype(mm_dtype)

    # VMEM budget: double-buffered x/cT/out + f32 acc; keep headroom and stay
    # under the v7x 64 MiB physical VMEM.
    elt = 2 if use_bf16 else 4
    vmem_need = 2 * tm * tk * elt + 2 * tk * tn * elt + 3 * tm * tn * 4
    vmem_limit = min(max(2 * vmem_need, 32 * 1024 * 1024), 48 * 1024 * 1024)

    grid = (n_pad // tm, u_pad // tn, f_pad // tk)
    out = pl.pallas_call(
        _rbf_mxu_kernel,
        out_shape=jax.ShapeDtypeStruct((n_pad, u_pad), jnp.float32),
        grid_spec=pltpu.PrefetchScalarGridSpec(
            num_scalar_prefetch=0,
            grid=grid,
            in_specs=[
                pl.BlockSpec((tm, tk), lambda i, j, k: (i, k)),   # x
                pl.BlockSpec((tk, tn), lambda i, j, k: (k, j)),   # c^T
                pl.BlockSpec((tm, 1), lambda i, j, k: (i, 0)),    # |x|^2
                pl.BlockSpec((1, tn), lambda i, j, k: (0, j)),    # |c|^2
                pl.BlockSpec((1, tn), lambda i, j, k: (0, j)),    # -1/r^2
            ],
            out_specs=pl.BlockSpec((tm, tn), lambda i, j, k: (i, j)),
            scratch_shapes=[pltpu.VMEM((tm, tn), jnp.float32)],
        ),
        compiler_params=pltpu.CompilerParams(
            dimension_semantics=("parallel", "parallel", "arbitrary"),
            vmem_limit_bytes=vmem_limit,
        ),
    )(x_mm, cT_mm, x2, c2, nir2)

    return out[:N, :U]


# ----------------------------------------------------------------------------
# Public entry point + pure-JAX reference.
# ----------------------------------------------------------------------------
def rbf_layer(x, c, r, *, tile_n=2048, tm=512, tn=512, tk=512, use_bf16=False):
    """x: (N, F), c: (U, F) or (1, U, F), r: (U,) -> (N, U)."""
    if c.ndim == 3:
        c = c.reshape(c.shape[-2], c.shape[-1])
    N, F = x.shape
    U = c.shape[0]
    # Route to the MXU whenever F is large (VPU path unrolls over F) or U is
    # large (VPU output tile (u_pad, tile_n) would blow vregs/VMEM).
    if F >= 64 or U > 64:
        return _rbf_large(x, c, r, tm=tm, tn=tn, tk=tk, use_bf16=use_bf16)
    return _rbf_small(x, c, r, tile_n=tile_n)


def rbf_reference(x, c, r):
    diff = c[None, :, :] - x[:, None, :]                  # (N, U, F)
    d2 = jnp.sum(jnp.square(diff), axis=-1)               # (N, U)
    return jnp.exp(-d2 / jnp.square(r)[None, :])          # (N, U)


if __name__ == "__main__":
    key = jax.random.PRNGKey(0)
    kx, kc, kr = jax.random.split(key, 3)

    # Module-default shapes: features=2, units=3, small batch.
    N, F, U = 16, 2, 3
    x = jax.random.normal(kx, (N, F), dtype=jnp.float32)
    c = jax.random.normal(kc, (U, F), dtype=jnp.float32)
    r = jax.random.normal(kr, (U,), dtype=jnp.float32)

    out = jax.block_until_ready(rbf_layer(x, c, r))
    ref = rbf_reference(x, c, r)
    assert out.shape == (N, U)
    assert jnp.allclose(out, ref, atol=1e-5, rtol=1e-5), "small-path mismatch"

    # Non-tile-aligned batch on the VPU path (exercises N padding + 2-step grid).
    N2 = 1000
    x2 = jax.random.normal(kx, (N2, F), dtype=jnp.float32)
    out2 = jax.block_until_ready(rbf_layer(x2, c, r))
    ref2 = rbf_reference(x2, c, r)
    assert out2.shape == (N2, U)
    assert jnp.allclose(out2, ref2, atol=1e-5, rtol=1e-5), "batch-path mismatch"

    # Production-sized F/U on the MXU path (exercises tile clamping + padding).
    N3, F3, U3 = 300, 200, 260
    x3 = 0.05 * jax.random.normal(kx, (N3, F3), dtype=jnp.float32)
    c3 = 0.05 * jax.random.normal(kc, (U3, F3), dtype=jnp.float32)
    r3 = jax.random.normal(kr, (U3,), dtype=jnp.float32) + 2.0
    out3 = jax.block_until_ready(rbf_layer(x3, c3, r3))
    ref3 = rbf_reference(x3, c3, r3)
    assert out3.shape == (N3, U3)
    assert jnp.allclose(out3, ref3, atol=1e-4, rtol=1e-4), "MXU-path mismatch"

    # Large-F / small-U shape that must route to the MXU path (routing fix).
    N4, F4, U4 = 256, 1024, 32
    x4 = 0.03 * jax.random.normal(kx, (N4, F4), dtype=jnp.float32)
    c4 = 0.03 * jax.random.normal(kc, (U4, F4), dtype=jnp.float32)
    r4 = jax.random.normal(kr, (U4,), dtype=jnp.float32) + 2.0
    out4 = jax.block_until_ready(rbf_layer(x4, c4, r4))
    ref4 = rbf_reference(x4, c4, r4)
    assert out4.shape == (N4, U4)
    assert jnp.allclose(out4, ref4, atol=1e-4, rtol=1e-4), "routing-path mismatch"

    print("KERNEL_OK")
</pallas_src>

<mosaic_0001>
module attributes {stable_mosaic.version = 11 : i64} {
  func.func @_rbf_vpu_kernel(%arg0: i32, %arg1: memref<2x128xf32, #tpu.memory_space<vmem>>, %arg2: memref<8x2xf32, #tpu.memory_space<vmem>>, %arg3: memref<8x1xf32, #tpu.memory_space<vmem>>, %arg4: memref<8x128xf32, #tpu.memory_space<vmem>>) attributes {dimension_semantics = [#tpu.dimension_semantics<parallel>], iteration_bounds = array<i64: 1>, scalar_prefetch = 0 : i64, scratch_operands = 0 : i64, tpu.core_type = #tpu.core_type<tc>, window_params = [{transform_indices = @transform_0, window_bounds = array<i64: 2, 128>}, {pipeline_mode = #tpu.pipeline_mode<synchronous>, transform_indices = @transform_1, window_bounds = array<i64: 8, 2>}, {pipeline_mode = #tpu.pipeline_mode<synchronous>, transform_indices = @transform_2, window_bounds = array<i64: 8, 1>}, {transform_indices = @transform_3, window_bounds = array<i64: 8, 128>}]} {
    %c0 = arith.constant 0 : index
    %c0_0 = arith.constant 0 : index
    %0 = vector.load %arg1[%c0, %c0_0] : memref<2x128xf32, #tpu.memory_space<vmem>>, vector<2x128xf32>
    %c0_1 = arith.constant 0 : index
    %c0_2 = arith.constant 0 : index
    %1 = vector.load %arg2[%c0_1, %c0_2] : memref<8x2xf32, #tpu.memory_space<vmem>>, vector<8x2xf32>
    %2 = vector.extract_strided_slice %1 {offsets = [0, 0], sizes = [8, 1], strides = [1, 1]} : vector<8x2xf32> to vector<8x1xf32>
    %3 = vector.extract_strided_slice %0 {offsets = [0, 0], sizes = [1, 128], strides = [1, 1]} : vector<2x128xf32> to vector<1x128xf32>
    %4 = vector.broadcast %2 : vector<8x1xf32> to vector<8x128xf32>
    %5 = vector.broadcast %3 : vector<1x128xf32> to vector<8x128xf32>
    %6 = arith.subf %4, %5 : vector<8x128xf32>
    %7 = arith.mulf %6, %6 : vector<8x128xf32>
    %8 = vector.extract_strided_slice %1 {offsets = [0, 1], sizes = [8, 1], strides = [1, 1]} : vector<8x2xf32> to vector<8x1xf32>
    %9 = vector.extract_strided_slice %0 {offsets = [1, 0], sizes = [1, 128], strides = [1, 1]} : vector<2x128xf32> to vector<1x128xf32>
    %10 = vector.broadcast %8 : vector<8x1xf32> to vector<8x128xf32>
    %11 = vector.broadcast %9 : vector<1x128xf32> to vector<8x128xf32>
    %12 = arith.subf %10, %11 : vector<8x128xf32>
    %13 = arith.mulf %12, %12 : vector<8x128xf32>
    %14 = arith.addf %7, %13 : vector<8x128xf32>
    %c0_3 = arith.constant 0 : index
    %c0_4 = arith.constant 0 : index
    %15 = vector.load %arg3[%c0_3, %c0_4] : memref<8x1xf32, #tpu.memory_space<vmem>>, vector<8x1xf32>
    %16 = vector.broadcast %15 : vector<8x1xf32> to vector<8x128xf32>
    %17 = arith.mulf %14, %16 : vector<8x128xf32>
    %18 = math.exp %17 : vector<8x128xf32>
    %c0_5 = arith.constant 0 : index
    %c0_6 = arith.constant 0 : index
    %19 = vector.load %arg4[%c0_5, %c0_6] : memref<8x128xf32, #tpu.memory_space<vmem>>, vector<8x128xf32>
    tpu.vector_store %arg4[%c0_5, %c0_6], %18 {strides = array<i32>} : memref<8x128xf32, #tpu.memory_space<vmem>>, vector<8x128xf32>,
    return
  }
  func.func @transform_0(%arg0: i32) -> (i32, i32) {
    %c0_i32 = arith.constant 0 : i32
    %c0_i32_0 = arith.constant 0 : i32
    return %c0_i32, %arg0 : i32, i32
  }
  func.func @transform_1(%arg0: i32) -> (i32, i32) {
    %c0_i32 = arith.constant 0 : i32
    %c0_i32_0 = arith.constant 0 : i32
    %c0_i32_1 = arith.constant 0 : i32
    return %c0_i32, %c0_i32_0 : i32, i32
  }
  func.func @transform_2(%arg0: i32) -> (i32, i32) {
    %c0_i32 = arith.constant 0 : i32
    %c0_i32_0 = arith.constant 0 : i32
    %c0_i32_1 = arith.constant 0 : i32
    return %c0_i32, %c0_i32_0 : i32, i32
  }
  func.func @transform_3(%arg0: i32) -> (i32, i32) {
    %c0_i32 = arith.constant 0 : i32
    %c0_i32_0 = arith.constant 0 : i32
    return %c0_i32, %arg0 : i32, i32
  }
}

</mosaic_0001>

<bundles_post_ra>
// kernel: tpu_custom_call.1
= control target key start
LH: loop header
LB: loop body
LE: loop exit
PB: predicated region body
PF: predicated region fallthrough
CT: control target
= control target key end

     0   :  { %v96_v2 = vmov 0   ;;  %s140_s0 = inlined_call_operand.vmem [shape: f32[2,128], index: 0, kind: input, shape index: {}]   ;;  %s141_s1 = inlined_call_operand.vmem [shape: f32[8,2], index: 1, kind: input, shape index: {}]   ;;  %s142_s2 = inlined_call_operand.vmem [shape: f32[8,1], index: 2, kind: input, shape index: {}]   ;;  %s143_s3 = inlined_call_operand.hbm [shape: f32[8,128], index: 3, kind: output, shape index: {}]  }
   0x1   :  { %v16_v0 = vld [vmem:[%s141_s1] sm:$0xff]  ;;  %66 = vset.pattern.permute.xlu0 %v96_v2  ;;  %68 = vset.pattern.permute.xlu1 %v96_v2 }
   0x2   :  { %v39_v1 = vld [vmem:[%s142_s2] sm:$0xff] }
   0x3   :  { %8 = vsyncpa [#allocation3], 0  ;;  %19 = vperm.xlu0 %66, %v16_v0   ;;  %42 = vperm.xlu1 %68, %v39_v1   ;;  %v97_v3 = vmov 1   ;;  %v22_v4 = vlaneseq  ;;  %v15_v7 = vld [vmem:[%s140_s0] sm:$0x3]  ;;  %s98_s1 = smov [#allocation2]  }
   0x4   :  { %s55_s2 = sshll.u32 %s98_s1, 4  ;;  %s56_s2 = int_to_ptr.vmem [resolvable:$true] %s55_s2 }
   0x5   :  { %v23_v5 = vshrl.u32 %v22_v4, 7  ;;  %s72_s0 = scalar_lea.vmem %s56_s2, 128  ;;  %p77_p1 = scmp.lt.s32.totalorder %s56_s2, %s56_s2 }
   0x6   :  { %p73_p0 = scmp.ne.s32.totalorder %s56_s2, %s72_s0  ;;  %p78_p2 = scmp.lt.s32.totalorder %s72_s0, %s72_s0 }
   0x7   :  { %67 = vset.pattern.permute.xlu0 %v97_v3  ;;  %v24_v6 = vsub.s32 0, %v23_v5  ;;  %v34_v8 = vsub.s32 1, %v23_v5 }
   0x8   :  { %29 = vperm.xlu0 %67, %v16_v0   ;;  %p79_p3 = por %p78_p2, %p77_p1 }
   0x9   :  { %v25_v10 = vrot.slane %v15_v7, %v24_v6  ;;  %v35_v11 = vrot.slane %v15_v7, %v34_v8 }
   0xa   :  { %p80_p4 = pnand %p79_p3, %p73_p0 }
   0xc   :  { %69 = vset.pattern.permute.xlu0 %v96_v2 }
  0x82   :  { %v20_v9 = vpop.permute.xlu0 %19  ;;  %v43_v17 = vpop.permute.xlu1 %42 }
  0x83   :  { %v26_v12 = vsub.f32 %v20_v9, %v25_v10 }
  0x85   :  { %v27_v15 = vmul.f32 %v26_v12, %v26_v12 }
  0x87   :  { %v30_v13 = vpop.permute.xlu0 %29 }
  0x88   :  { %v36_v14 = vsub.f32 %v30_v13, %v35_v11 }
  0x8a   :  { %v37_v16 = vmul.f32 %v36_v14, %v36_v14 }
  0x8c   :  { %v38_v18 = vadd.f32 %v37_v16, %v27_v15 }
  0x8e   :  { %v45_v19 = vmul.f32 %v43_v17, %v38_v18 }
  0x90   :  { %v46_v20 = vmul.f32 1.442695, %v45_v19 }
  0x92   :  { %70 = vpow2.f32 %v46_v20 }
  0x9c   :  { %v71_v21 = vpop.eup %70 }
  0x9d   :  { %48 = vst [vmem:[#allocation2] sm:$0xff] %v71_v21 }
  0x9e   :  { %83 = shalt.err (!%p80_p4)
}
  0x9f   :  { %s84_s20 = scalar_lea.hbm %s143_s3, 128 }
  0xa0   :  { %p85_p5 = scmp.ne.s32.totalorder %s143_s3, %s84_s20  ;;  %p88_p6 = scmp.lt.u32.totalorder %s84_s20, %s143_s3 }
  0xa2   :  { %p90_p7 = pnand %p88_p6, %p85_p5 }
  0xa4   :  { %93 = shalt.err (!%p90_p7)
}
  0xa5   :  { %58 = dma.vmem_to_hbm [thread:$0]  %s56_s2, 128, %s143_s3, [#allocation3]  }
  0xa6   :  { %94 = dma.done.wait [#allocation3], 128  }
  0xa7   :  { %95 = vsyncadd [#allocation3], 4294967168 }
  0xa8   :  { %62 = vsyncpa [#allocation3], 1 }

</bundles_post_ra>
